<compile_context>
chip_gen: v7x
topology: tpu7x:2x2x1
jax: 0.10.0
libtpu: 0.0.40
codegen_flags: <defaults>
</compile_context>

<pallas_src>
import jax
import jax.numpy as jnp
from jax.experimental import pallas as pl
from jax.experimental.pallas import tpu as pltpu

_EPS = 1e-6  # matches torch.nn.functional.pairwise_distance default


def _l2dist_kernel(x_ref, y_ref, o_ref):
    # x_ref, y_ref: (TB, D) VMEM tiles; o_ref: (1, TB) lane-dense output row.
    x = x_ref[...].astype(jnp.float32)          # in-kernel cast (VPU, free slot)
    y = y_ref[...].astype(jnp.float32)
    diff = x - y + _EPS                         # VPU
    ssq = jnp.sum(diff * diff, axis=-1, keepdims=True)   # (TB, 1), XLU lane reduce
    dist = jnp.sqrt(ssq)                        # EUP
    # Transpose (TB, 1) -> (1, TB): XLU relayout so the store is lane-dense
    # (unmasked vst) instead of a 1-lane masked partial store.
    o_ref[...] = dist.T.astype(o_ref.dtype)


def _choose_tile_rows(B: int, D: int, itemsize: int) -> int:
    # Per grid step VMEM ~= 2 inputs x 2 pipeline buffers x (TB * D * itemsize)
    # plus a tiny (1, TB) output row. Budget conservatively so it fits the
    # default scoped VMEM on all generations (v5e 16 MiB, v6e/v7x 32 MiB).
    budget = 8 * 1024 * 1024
    bytes_per_row = 4 * D * itemsize            # 2 inputs x 2 buffers
    tb = budget // max(bytes_per_row, 1)
    tb = min(tb, 2048)
    if tb >= B:
        return B                                # single full-extent block
    # When tiling, keep the tile a multiple of 128: satisfies the sublane
    # constraint on the (TB, D) input blocks and the lane constraint on the
    # (1, TB) lane-dense output block.
    return max((tb // 128) * 128, 128)
    # TODO(synk): if D is so large that even a 128-row tile blows VMEM, add an
    # innermost "arbitrary" grid axis over D with a (TB, 1) f32 accumulator and
    # pl.when(k == 0)/pl.when(k == last) init/finalize.


def l2dist(x1: jax.Array, x2: jax.Array) -> jax.Array:
    """Pallas equivalent of torch.nn.functional.pairwise_distance(x1, x2)."""
    assert x1.shape == x2.shape and x1.ndim == 2
    B, D = x1.shape
    out_dtype = jnp.result_type(x1.dtype, x2.dtype)
    itemsize = max(jnp.dtype(x1.dtype).itemsize, jnp.dtype(x2.dtype).itemsize)

    tb = _choose_tile_rows(B, D, itemsize)

    if tb >= B:
        tb = B
        b_pad = B
    else:
        b_pad = pl.cdiv(B, tb) * tb
        if b_pad != B:
            # Pad ragged tail with zeros; padded rows are computed and sliced off.
            pad = ((0, b_pad - B), (0, 0))
            x1 = jnp.pad(x1, pad)
            x2 = jnp.pad(x2, pad)

    grid = (b_pad // tb,)

    cost = pl.CostEstimate(
        flops=3 * b_pad * D,
        transcendentals=b_pad,
        bytes_accessed=2 * b_pad * D * itemsize
        + b_pad * jnp.dtype(out_dtype).itemsize,
    )

    out = pl.pallas_call(
        _l2dist_kernel,
        out_shape=jax.ShapeDtypeStruct((1, b_pad), out_dtype),
        grid_spec=pltpu.PrefetchScalarGridSpec(
            num_scalar_prefetch=0,
            grid=grid,
            in_specs=[
                pl.BlockSpec((tb, D), lambda i: (i, 0)),
                pl.BlockSpec((tb, D), lambda i: (i, 0)),
            ],
            out_specs=pl.BlockSpec((1, tb), lambda i: (0, i)),
        ),
        compiler_params=pltpu.CompilerParams(
            dimension_semantics=("parallel",),
        ),
        cost_estimate=cost,
    )(x1, x2)

    # keepdim=False -> (B,)
    return out[0, :B]


def _reference(x1, x2):
    return jnp.sqrt(jnp.sum((x1 - x2 + _EPS) ** 2, axis=-1))


if __name__ == "__main__":
    key = jax.random.PRNGKey(0)
    k1, k2 = jax.random.split(key)

    # Small embedding batch, matching the Siamese-net forward.
    B, D = 8, 32
    input_embedding = jax.random.normal(k1, (B, D), dtype=jnp.float32)
    validation_embedding = jax.random.normal(k2, (B, D), dtype=jnp.float32)

    dist = jax.block_until_ready(l2dist(input_embedding, validation_embedding))
    ref = _reference(input_embedding, validation_embedding)
    assert dist.shape == (B,)
    assert jnp.allclose(dist, ref, rtol=2e-5, atol=1e-4), (dist, ref)

    # Larger ragged batch to exercise the tiled / pipelined / padded path.
    k3, k4 = jax.random.split(k2)
    B2, D2 = 1300, 1024
    a2 = jax.random.normal(k3, (B2, D2), dtype=jnp.float32)
    b2 = jax.random.normal(k4, (B2, D2), dtype=jnp.float32)
    dist2 = jax.block_until_ready(l2dist(a2, b2))
    ref2 = _reference(a2, b2)
    assert dist2.shape == (B2,)
    assert jnp.allclose(dist2, ref2, rtol=2e-5, atol=1e-4)

    print("KERNEL_OK")
</pallas_src>

<mosaic_0001>
module attributes {stable_mosaic.version = 11 : i64} {
  func.func @_l2dist_kernel(%arg0: i32, %arg1: memref<8x32xf32, #tpu.memory_space<vmem>>, %arg2: memref<8x32xf32, #tpu.memory_space<vmem>>, %arg3: memref<1x8xf32, #tpu.memory_space<vmem>>) attributes {dimension_semantics = [#tpu.dimension_semantics<parallel>], iteration_bounds = array<i64: 1>, scalar_prefetch = 0 : i64, scratch_operands = 0 : i64, tpu.core_type = #tpu.core_type<tc>, window_params = [{transform_indices = @transform_0, window_bounds = array<i64: 8, 32>}, {transform_indices = @transform_1, window_bounds = array<i64: 8, 32>}, {transform_indices = @transform_2, window_bounds = array<i64: 1, 8>}]} {
    %c0 = arith.constant 0 : index
    %c0_0 = arith.constant 0 : index
    %0 = vector.load %arg1[%c0, %c0_0] : memref<8x32xf32, #tpu.memory_space<vmem>>, vector<8x32xf32>
    %c0_1 = arith.constant 0 : index
    %c0_2 = arith.constant 0 : index
    %1 = vector.load %arg2[%c0_1, %c0_2] : memref<8x32xf32, #tpu.memory_space<vmem>>, vector<8x32xf32>
    %2 = arith.subf %0, %1 : vector<8x32xf32>
    %cst = arith.constant 9.99999997E-7 : f32
    %3 = vector.broadcast %cst : f32 to vector<8x32xf32>
    %4 = arith.addf %2, %3 : vector<8x32xf32>
    %5 = arith.mulf %4, %4 : vector<8x32xf32>
    %cst_3 = arith.constant dense<0.000000e+00> : vector<8xf32>
    %6 = vector.multi_reduction <add>, %5, %cst_3 [1] : vector<8x32xf32> to vector<8xf32>
    %7 = vector.shape_cast %6 : vector<8xf32> to vector<8x1xf32>
    %8 = math.sqrt %7 : vector<8x1xf32>
    %9 = tpu.transpose %8, [1, 0] : vector<8x1xf32> -> vector<1x8xf32>
    %c0_4 = arith.constant 0 : index
    %c0_5 = arith.constant 0 : index
    %10 = vector.load %arg3[%c0_4, %c0_5] : memref<1x8xf32, #tpu.memory_space<vmem>>, vector<1x8xf32>
    tpu.vector_store %arg3[%c0_4, %c0_5], %9 {strides = array<i32>} : memref<1x8xf32, #tpu.memory_space<vmem>>, vector<1x8xf32>,
    return
  }
  func.func @transform_0(%arg0: i32) -> (i32, i32) {
    %c0_i32 = arith.constant 0 : i32
    %c0_i32_0 = arith.constant 0 : i32
    return %arg0, %c0_i32 : i32, i32
  }
  func.func @transform_1(%arg0: i32) -> (i32, i32) {
    %c0_i32 = arith.constant 0 : i32
    %c0_i32_0 = arith.constant 0 : i32
    return %arg0, %c0_i32 : i32, i32
  }
  func.func @transform_2(%arg0: i32) -> (i32, i32) {
    %c0_i32 = arith.constant 0 : i32
    %c0_i32_0 = arith.constant 0 : i32
    return %c0_i32, %arg0 : i32, i32
  }
}

</mosaic_0001>

<bundles_post_ra>
// kernel: tpu_custom_call.1
= control target key start
LH: loop header
LB: loop body
LE: loop exit
PB: predicated region body
PF: predicated region fallthrough
CT: control target
= control target key end

     0   :  { %7 = vsyncpa [#allocation3], 0  ;;  %s234_s0 = inlined_call_operand.hbm [shape: f32[8,32], index: 0, kind: input, shape index: {}]   ;;  %s235_s1 = inlined_call_operand.hbm [shape: f32[8,32], index: 1, kind: input, shape index: {}]   ;;  %s236_s2 = inlined_call_operand.hbm [shape: f32[1,8], index: 2, kind: output, shape index: {}]  }
   0x1   :  { %8 = vsyncpa [#allocation6], 0 }
   0x2   :  { %9 = vsyncpa [#allocation4], 0  ;;  %s180_s9 = smov [#allocation2]   ;;  %s181_s11 = smov [#allocation5]  }
   0x3   :  { %s16_s10 = sshll.u32 %s180_s9, 4  ;;  %s26_s12 = sshll.u32 %s181_s11, 4  ;;  %s17_s10 = int_to_ptr.vmem [resolvable:$true] %s16_s10  ;;  %s27_s12 = int_to_ptr.vmem [resolvable:$true] %s26_s12 }
   0x4   :  { %s108_s15 = scalar_lea.hbm %s234_s0, 128 }
   0x5   :  { %p109_p0 = scmp.ne.s32.totalorder %s234_s0, %s108_s15  ;;  %p112_p1 = scmp.lt.u32.totalorder %s108_s15, %s234_s0 }
   0x7   :  { %p114_p2 = pnand %p112_p1, %p109_p0 }
   0x9   :  { %117 = shalt.err (!%p114_p2)
}
   0xa   :  { %s118_s20 = scalar_lea.vmem %s17_s10, 128  ;;  %p123_p4 = scmp.lt.s32.totalorder %s17_s10, %s17_s10 }
   0xb   :  { %p119_p3 = scmp.ne.s32.totalorder %s17_s10, %s118_s20  ;;  %p124_p5 = scmp.lt.s32.totalorder %s118_s20, %s118_s20 }
   0xd   :  { %p125_p6 = por %p124_p5, %p123_p4 }
   0xf   :  { %p126_p7 = pnand %p125_p6, %p119_p3 }
  0x11   :  { %129 = shalt.err (!%p126_p7)
}
  0x12   :  { %19 = dma.hbm_to_vmem [thread:$0]  %s234_s0, 128, %s17_s10, [#allocation3]  }
  0x13   :  { %s130_s25 = scalar_lea.hbm %s235_s1, 128 }
  0x14   :  { %p131_p8 = scmp.ne.s32.totalorder %s235_s1, %s130_s25  ;;  %p134_p9 = scmp.lt.u32.totalorder %s130_s25, %s235_s1 }
  0x16   :  { %p136_p10 = pnand %p134_p9, %p131_p8 }
  0x18   :  { %139 = shalt.err (!%p136_p10)
}
  0x19   :  { %s140_s30 = scalar_lea.vmem %s27_s12, 128  ;;  %p145_p12 = scmp.lt.s32.totalorder %s27_s12, %s27_s12 }
  0x1a   :  { %p141_p11 = scmp.ne.s32.totalorder %s27_s12, %s140_s30  ;;  %p146_p13 = scmp.lt.s32.totalorder %s140_s30, %s140_s30 }
  0x1c   :  { %p147_p0 = por %p146_p13, %p145_p12 }
  0x1e   :  { %p148_p1 = pnand %p147_p0, %p141_p11 }
  0x20   :  { %151 = shalt.err (!%p148_p1)
}
  0x21   :  { %29 = dma.hbm_to_vmem [thread:$0]  %s235_s1, 128, %s27_s12, [#allocation6]  }
  0x22   :  { %174 = dma.done.wait [#allocation3], 128  }
  0x23   :  { %175 = vsyncadd [#allocation3], 4294967168 }
  0x24   :  { %176 = dma.done.wait [#allocation6], 128  }
  0x25   :  { %177 = vsyncadd [#allocation6], 4294967168  ;;  %v36_v0 = vld [vmem:[#allocation2] sm:$0xff]  ;;  %v37_v1 = vld [vmem:[#allocation5] sm:$0xff]  ;;  %vm41_vm0 = vcmask 261120   ;;  %s182_s1 = smov [#allocation7]  }
  0x26   :  { %v38_v2 = vsub.f32 %v36_v0, %v37_v1  ;;  %s92_s4 = sshll.u32 %s182_s1, 4  ;;  %vm84_vm3 = vcmask 57344   ;;  %s93_s4 = int_to_ptr.vmem [resolvable:$true] %s92_s4 }
  0x27   :  { %s152_s5 = scalar_lea.vmem %s93_s4, 16  ;;  %s156_s6 = scalar_lea.vmem %s93_s4, 32 }
  0x28   :  { %v39_v3 = vadd.f32 1e-06, %v38_v2  ;;  %p153_p2 = scmp.ne.s32.totalorder %s93_s4, %s152_s5  ;;  %p157_p3 = scmp.lt.s32.totalorder %s93_s4, %s93_s4 }
  0x29   :  { %p158_p4 = scmp.lt.s32.totalorder %s156_s6, %s152_s5 }
  0x2a   :  { %v40_v4 = vmul.f32 %v39_v3, %v39_v3 }
  0x2b   :  { %p159_p5 = por %p158_p4, %p157_p3 }
  0x2c   :  { %v42_v5 = vsel %vm41_vm0, %v40_v4, 0.0 }
  0x2d   :  { %43 = vadd.xlane.f32.xlu0 %v42_v5  ;;  %p160_p6 = pnand %p159_p5, %p153_p2 }
  0xba   :  { %v44_v6 = vpop.xlane.xlu0 %43 }
  0xbb   :  { %106 = vrsqrt.f32 %v44_v6  ;;  %vm47_vm1 = vcmp.eq.f32.partialorder %v44_v6, inf  ;;  %v50_v9 = vand.u32 2147483648, %v44_v6  ;;  %vm49_vm2 = vcmp.eq.f32.partialorder %v44_v6, 0.0 }
  0xc5   :  { %v107_v7 = vpop.eup %106 }
  0xc6   :  { %v46_v8 = vmul.f32 %v107_v7, %v44_v6 }
  0xc8   :  { %v48_v10 = vsel %vm47_vm1, %v44_v6, %v46_v8 }
  0xc9   :  { %v51_v11 = vsel %vm49_vm2, %v50_v9, %v48_v10 }
  0xca   :  { %52 = vxpose.xlu0.b32.start.end [1/1] (short) (narrow) %v51_v11, 8 }
 0x14a   :  { %v68_v12 = vpop.trf.xlu0 }
 0x14b   :  { %85 = vst.msk [vmem:[#allocation7] sm:$0x1] %vm84_vm3, %v68_v12 }
 0x14c   :  { %163 = shalt.err (!%p160_p6)
}
 0x14d   :  { %s164_s9 = scalar_lea.hbm %s236_s2, 16 }
 0x14e   :  { %p165_p7 = scmp.ne.s32.totalorder %s236_s2, %s164_s9  ;;  %p168_p8 = scmp.lt.u32.totalorder %s164_s9, %s236_s2 }
 0x150   :  { %p170_p9 = pnand %p168_p8, %p165_p7 }
 0x152   :  { %173 = shalt.err (!%p170_p9)
}
 0x153   :  { %95 = dma.vmem_to_hbm [thread:$0]  %s93_s4, 16, %s236_s2, [#allocation4]  }
 0x154   :  { %178 = dma.done.wait [#allocation4], 16  }
 0x155   :  { %179 = vsyncadd [#allocation4], 4294967280 }
 0x156   :  { %99 = vsyncpa [#allocation3], 1 }
 0x157   :  { %100 = vsyncpa [#allocation6], 1 }
 0x158   :  { %101 = vsyncpa [#allocation4], 1 }

</bundles_post_ra>
